<compile_context>
chip_gen: v7x
topology: tpu7x:2x2x1
jax: 0.10.0
libtpu: 0.0.40
codegen_flags: <defaults>
</compile_context>

<pallas_src>
import jax
import jax.numpy as jnp
from jax.experimental import pallas as pl
from jax.experimental.pallas import tpu as pltpu


def net_kernel(x_ref, w1_ref, b1_ref, w2_ref, b2_ref, out_ref):
    x = x_ref[...]                                                # [B, F]

    # fc1 + ReLU  (hidden dim padded to a multiple of 128 by the wrapper)
    h = jnp.dot(x, w1_ref[...], preferred_element_type=jnp.float32) + b1_ref[...]
    h = jnp.maximum(h, 0.0)                                       # [B, Hp]

    # fc2
    logits = (jnp.dot(h, w2_ref[...], preferred_element_type=jnp.float32)
              + b2_ref[...])                                      # [B, A]

    # softmax over the action axis (PyTorch F.softmax on a 2-D input -> dim=1)
    m = jnp.max(logits, axis=-1, keepdims=True)
    e = jnp.exp(logits - m)
    denom = jnp.sum(e, axis=-1, keepdims=True)
    out_ref[...] = (e * pl.reciprocal(denom, approx=True)).astype(out_ref.dtype)


def net_forward(x, w1, b1, w2, b2):
    """x: [B, F]; w1: [F, H]; b1: [H]; w2: [H, A]; b2: [A]  ->  probs [B, A]."""
    B, F = x.shape
    H = w1.shape[1]
    A = w2.shape[1]

    # Zero-pad the hidden dim to a multiple of 128 (200 -> 256) for lane-aligned
    # vregs and a clean MXU contraction dimension. Exact-preserving (see header).
    Hp = ((H + 127) // 128) * 128
    if Hp != H:
        w1 = jnp.pad(w1, ((0, 0), (0, Hp - H)))
        b1 = jnp.pad(b1, (0, Hp - H))
        w2 = jnp.pad(w2, ((0, Hp - H), (0, 0)))

    # Biases as 2-D rows so they broadcast over the batch inside the kernel.
    b1_2d = b1.reshape(1, Hp)
    b2_2d = b2.reshape(1, A)

    vmem_spec = pl.BlockSpec(memory_space=pltpu.MemorySpace.VMEM)
    return pl.pallas_call(
        net_kernel,
        out_shape=jax.ShapeDtypeStruct((B, A), jnp.float32),
        in_specs=[vmem_spec] * 5,
        out_specs=vmem_spec,
    )(x, w1, b1_2d, w2, b2_2d)


def init_params(key, n_features, n_actions, hidden=200):
    k1, k2, k3, k4 = jax.random.split(key, 4)
    # Deterministic synthetic init (PyTorch-Linear-like uniform bounds), already
    # laid out as [in, out] so the kernel never transposes.
    bound1 = 1.0 / jnp.sqrt(n_features)
    bound2 = 1.0 / jnp.sqrt(hidden)
    w1 = jax.random.uniform(k1, (n_features, hidden), jnp.float32, -bound1, bound1)
    b1 = jax.random.uniform(k2, (hidden,), jnp.float32, -bound1, bound1)
    w2 = jax.random.uniform(k3, (hidden, n_actions), jnp.float32, -bound2, bound2)
    b2 = jax.random.uniform(k4, (n_actions,), jnp.float32, -bound2, bound2)
    return w1, b1, w2, b2


if __name__ == "__main__":
    n_features = 16
    n_actions = 4
    batch = 8

    key = jax.random.PRNGKey(0)
    kx, kp = jax.random.split(key)
    x = jax.random.normal(kx, (batch, n_features), jnp.float32)
    w1, b1, w2, b2 = init_params(kp, n_features, n_actions)

    probs = net_forward(x, w1, b1, w2, b2)
    probs = jax.block_until_ready(probs)

    # Reference check in plain JAX (same math as the PyTorch forward).
    h_ref = jnp.maximum(x @ w1 + b1, 0.0)
    logits_ref = h_ref @ w2 + b2
    p_ref = jax.nn.softmax(logits_ref, axis=1)
    assert probs.shape == (batch, n_actions)
    # Tolerance relaxed slightly for the EUP approximate reciprocal in softmax.
    assert jnp.allclose(probs, p_ref, atol=2e-3, rtol=2e-3)
    assert jnp.allclose(jnp.sum(probs, axis=1), 1.0, atol=2e-3)

    print("KERNEL_OK")
</pallas_src>

<mosaic_0001>
module attributes {stable_mosaic.version = 11 : i64} {
  func.func @net_kernel(%arg0: memref<8x16xf32, #tpu.memory_space<vmem>>, %arg1: memref<16x256xf32, #tpu.memory_space<vmem>>, %arg2: memref<1x256xf32, #tpu.memory_space<vmem>>, %arg3: memref<256x4xf32, #tpu.memory_space<vmem>>, %arg4: memref<1x4xf32, #tpu.memory_space<vmem>>, %arg5: memref<8x4xf32, #tpu.memory_space<vmem>>) attributes {dimension_semantics = [], scalar_prefetch = 0 : i64, scratch_operands = 0 : i64, tpu.core_type = #tpu.core_type<tc>} {
    %c0 = arith.constant 0 : index
    %c0_0 = arith.constant 0 : index
    %0 = vector.load %arg0[%c0, %c0_0] : memref<8x16xf32, #tpu.memory_space<vmem>>, vector<8x16xf32>
    %c0_1 = arith.constant 0 : index
    %c0_2 = arith.constant 0 : index
    %1 = vector.load %arg1[%c0_1, %c0_2] : memref<16x256xf32, #tpu.memory_space<vmem>>, vector<16x256xf32>
    %cst = arith.constant dense<0.000000e+00> : vector<8x256xf32>
    %2 = tpu.matmul %0, %1, %cst {dimension_numbers = #tpu.dot_dimension_numbers<[1], [0], [0], [1], [0, 0, 1, 1], [], []>} : vector<8x16xf32>, vector<16x256xf32>, vector<8x256xf32> -> vector<8x256xf32>
    %c0_3 = arith.constant 0 : index
    %c0_4 = arith.constant 0 : index
    %3 = vector.load %arg2[%c0_3, %c0_4] : memref<1x256xf32, #tpu.memory_space<vmem>>, vector<1x256xf32>
    %4 = vector.broadcast %3 : vector<1x256xf32> to vector<8x256xf32>
    %5 = arith.addf %2, %4 : vector<8x256xf32>
    %cst_5 = arith.constant 0.000000e+00 : f32
    %6 = vector.broadcast %cst_5 : f32 to vector<8x256xf32>
    %7 = arith.maximumf %5, %6 : vector<8x256xf32>
    %c0_6 = arith.constant 0 : index
    %c0_7 = arith.constant 0 : index
    %8 = vector.load %arg3[%c0_6, %c0_7] : memref<256x4xf32, #tpu.memory_space<vmem>>, vector<256x4xf32>
    %cst_8 = arith.constant dense<0.000000e+00> : vector<8x4xf32>
    %9 = tpu.matmul %7, %8, %cst_8 {dimension_numbers = #tpu.dot_dimension_numbers<[1], [0], [0], [1], [0, 0, 1, 1], [], []>} : vector<8x256xf32>, vector<256x4xf32>, vector<8x4xf32> -> vector<8x4xf32>
    %c0_9 = arith.constant 0 : index
    %c0_10 = arith.constant 0 : index
    %10 = vector.load %arg4[%c0_9, %c0_10] : memref<1x4xf32, #tpu.memory_space<vmem>>, vector<1x4xf32>
    %11 = vector.broadcast %10 : vector<1x4xf32> to vector<8x4xf32>
    %12 = arith.addf %9, %11 : vector<8x4xf32>
    %cst_11 = arith.constant dense<0xFF800000> : vector<8xf32>
    %13 = vector.multi_reduction <maximumf>, %12, %cst_11 [1] : vector<8x4xf32> to vector<8xf32>
    %14 = vector.shape_cast %13 : vector<8xf32> to vector<8x1xf32>
    %15 = vector.broadcast %14 : vector<8x1xf32> to vector<8x4xf32>
    %16 = arith.subf %12, %15 : vector<8x4xf32>
    %17 = math.exp %16 : vector<8x4xf32>
    %cst_12 = arith.constant dense<0.000000e+00> : vector<8xf32>
    %18 = vector.multi_reduction <add>, %17, %cst_12 [1] : vector<8x4xf32> to vector<8xf32>
    %19 = vector.shape_cast %18 : vector<8xf32> to vector<8x1xf32>
    %20 = tpu.reciprocal %19 {approx = true} : vector<8x1xf32> -> vector<8x1xf32>
    %21 = vector.broadcast %20 : vector<8x1xf32> to vector<8x4xf32>
    %22 = arith.mulf %17, %21 : vector<8x4xf32>
    %c0_13 = arith.constant 0 : index
    %c0_14 = arith.constant 0 : index
    %23 = vector.load %arg5[%c0_13, %c0_14] : memref<8x4xf32, #tpu.memory_space<vmem>>, vector<8x4xf32>
    tpu.vector_store %arg5[%c0_13, %c0_14], %22 {strides = array<i32>} : memref<8x4xf32, #tpu.memory_space<vmem>>, vector<8x4xf32>,
    return
  }
}

</mosaic_0001>

<bundles_post_ra>
// kernel: tpu_custom_call.1
= control target key start
LH: loop header
LB: loop body
LE: loop exit
PB: predicated region body
PF: predicated region fallthrough
CT: control target
= control target key end

     0   :  { %v318_v3 = vmov 0.0   ;;  %vm37_vm0 = vcmask 130048   ;;  %v27_v56 = vlaneseq  ;;  %vm223_vm1 = vcmask 31744   ;;  %s472_s1 = inlined_call_operand.vmem [shape: f32[16,256], index: 1, kind: input, shape index: {}]   ;;  %s473_s0 = inlined_call_operand.vmem [shape: f32[8,16], index: 0, kind: input, shape index: {}]   ;;  %s474_s3 = inlined_call_operand.vmem [shape: f32[256,4], index: 3, kind: input, shape index: {}]   ;;  %s475_s2 = inlined_call_operand.vmem [shape: f32[1,256], index: 2, kind: input, shape index: {}]   ;;  %s476_s4 = inlined_call_operand.vmem [shape: f32[1,4], index: 4, kind: input, shape index: {}]   ;;  %s477_s5 = inlined_call_operand.vmem [shape: f32[8,4], index: 5, kind: output, shape index: {}]  }
   0x1   :  { %v22_v0 = vld [vmem:[%s472_s1 + $0x8] sm:$0xff]  ;;  %v24_v1 = vld [vmem:[%s472_s1 + $0x18] sm:$0xff]  ;;  %v21_v2 = vld [vmem:[%s472_s1] sm:$0xff]  ;;  %105 = vmatprep.mubr.f32.mxu0 %v318_v3 }
   0x2   :  { %v277_v4 = vpack.c.bf16 %v24_v1, %v22_v0  ;;  %v23_v5 = vld [vmem:[%s472_s1 + $0x10] sm:$0xff]  ;;  %v130_v6 = vld [vmem:[%s474_s3 + $0x80] sm:$0xff]  ;;  %v131_v9 = vld [vmem:[%s474_s3 + $0x88] sm:$0xff]  ;;  %v28_v57 = vshrl.u32 %v27_v56, 7 }
   0x3   :  { %v279_v7 = vpack.c.bf16 %v23_v5, %v21_v2  ;;  %v20_v8 = vld [vmem:[%s473_s0] sm:$0xff]  ;;  %v115_v11 = vld [vmem:[%s474_s3 + $0x8] sm:$0xff]  ;;  %v281_v12 = vpack.c.bf16 %v131_v9, %v130_v6  ;;  %v132_v14 = vld [vmem:[%s474_s3 + $0x90] sm:$0xff] }
   0x4   :  { %v114_v10 = vld [vmem:[%s474_s3] sm:$0xff]  ;;  %278 = vmatprep.subr.bf16.mxu0 %v277_v4  ;;  %v133_v15 = vld [vmem:[%s474_s3 + $0x98] sm:$0xff]  ;;  %v116_v16 = vld [vmem:[%s474_s3 + $0x10] sm:$0xff]  ;;  %v29_v58 = vsub.s32 0, %v28_v57  ;;  %v33_v60 = vsub.s32 1, %v28_v57 }
   0x5   :  { %v283_v13 = vpack.c.bf16 %v115_v11, %v114_v10  ;;  %280 = vmatpush1.bf16.msra.mxu0 %v279_v7  ;;  %v285_v17 = vpack.c.bf16 %v133_v15, %v132_v14  ;;  %v117_v18 = vld [vmem:[%s474_s3 + $0x18] sm:$0xff]  ;;  %v134_v19 = vld [vmem:[%s474_s3 + $0xa0] sm:$0xff]  ;;  %v135_v20 = vld [vmem:[%s474_s3 + $0xa8] sm:$0xff]  ;;  %282 = vmatprep.subr.bf16.mxu1 %v281_v12 }
   0x6   :  { %v287_v21 = vpack.c.bf16 %v117_v18, %v116_v16  ;;  %v289_v22 = vpack.c.bf16 %v135_v20, %v134_v19  ;;  %v118_v23 = vld [vmem:[%s474_s3 + $0x20] sm:$0xff]  ;;  %v119_v24 = vld [vmem:[%s474_s3 + $0x28] sm:$0xff]  ;;  %v136_v25 = vld [vmem:[%s474_s3 + $0xb0] sm:$0xff] }
   0x7   :  { %284 = vmatpush3.bf16.msra.mxu1 %v283_v13  ;;  %v137_v26 = vld [vmem:[%s474_s3 + $0xb8] sm:$0xff]  ;;  %v291_v27 = vpack.c.bf16 %v119_v24, %v118_v23  ;;  %v120_v29 = vld [vmem:[%s474_s3 + $0x30] sm:$0xff]  ;;  %v138_v31 = vld [vmem:[%s474_s3 + $0xc0] sm:$0xff] }
   0x8   :  { %240 = vmatmul.mubr.msk.f32.vlgmr.msra.gmra.mrb[0].mxu0 %vm37_vm0, %v20_v8  ;;  %286 = vmatprep.subr.bf16.mxu1 %v285_v17  ;;  %v293_v28 = vpack.c.bf16 %v137_v26, %v136_v25  ;;  %v121_v30 = vld [vmem:[%s474_s3 + $0x38] sm:$0xff]  ;;  %v139_v32 = vld [vmem:[%s474_s3 + $0xc8] sm:$0xff]  ;;  %v122_v35 = vld [vmem:[%s474_s3 + $0x40] sm:$0xff] }
   0x9   :  { %v295_v33 = vpack.c.bf16 %v121_v30, %v120_v29  ;;  %v297_v34 = vpack.c.bf16 %v139_v32, %v138_v31  ;;  %v123_v36 = vld [vmem:[%s474_s3 + $0x48] sm:$0xff]  ;;  %v140_v37 = vld [vmem:[%s474_s3 + $0xd0] sm:$0xff]  ;;  %v141_v38 = vld [vmem:[%s474_s3 + $0xd8] sm:$0xff] }
   0xa   :  { %v299_v39 = vpack.c.bf16 %v123_v36, %v122_v35  ;;  %v301_v40 = vpack.c.bf16 %v141_v38, %v140_v37  ;;  %v124_v41 = vld [vmem:[%s474_s3 + $0x50] sm:$0xff]  ;;  %v125_v42 = vld [vmem:[%s474_s3 + $0x58] sm:$0xff]  ;;  %v142_v43 = vld [vmem:[%s474_s3 + $0xe0] sm:$0xff] }
   0xb   :  { %288 = vmatpush3.bf16.msra.mxu1 %v287_v21  ;;  %v143_v44 = vld [vmem:[%s474_s3 + $0xe8] sm:$0xff]  ;;  %v303_v45 = vpack.c.bf16 %v125_v42, %v124_v41  ;;  %v126_v47 = vld [vmem:[%s474_s3 + $0x60] sm:$0xff]  ;;  %v144_v50 = vld [vmem:[%s474_s3 + $0xf0] sm:$0xff] }
   0xc   :  { %290 = vmatprep.subr.bf16.mxu1 %v289_v22  ;;  %v305_v46 = vpack.c.bf16 %v143_v44, %v142_v43  ;;  %v127_v48 = vld [vmem:[%s474_s3 + $0x68] sm:$0xff]  ;;  %v145_v51 = vld [vmem:[%s474_s3 + $0xf8] sm:$0xff]  ;;  %v128_v53 = vld [vmem:[%s474_s3 + $0x70] sm:$0xff] }
   0xd   :  { %v307_v49 = vpack.c.bf16 %v127_v48, %v126_v47  ;;  %v309_v52 = vpack.c.bf16 %v145_v51, %v144_v50  ;;  %v129_v54 = vld [vmem:[%s474_s3 + $0x78] sm:$0xff]  ;;  %v25_v59 = vld [vmem:[%s475_s2] sm:$0x3] }
   0xe   :  { %v311_v55 = vpack.c.bf16 %v129_v54, %v128_v53  ;;  %v30_v61 = vrot.slane %v25_v59, %v29_v58  ;;  %v34_v62 = vrot.slane %v25_v59, %v33_v60  ;;  %v241_v7 = vld [vmem:[%s476_s4] ss:$0 sm:$0xff] }
   0xf   :  { %292 = vmatpush3.bf16.msra.mxu1 %v291_v27 }
  0x10   :  { %294 = vmatprep.subr.bf16.mxu1 %v293_v28 }
  0x13   :  { %296 = vmatpush3.bf16.msra.mxu1 %v295_v33 }
  0x14   :  { %298 = vmatprep.subr.bf16.mxu1 %v297_v34 }
  0x17   :  { %300 = vmatpush3.bf16.msra.mxu1 %v299_v39 }
  0x18   :  { %302 = vmatprep.subr.bf16.mxu1 %v301_v40 }
  0x1b   :  { %304 = vmatpush3.bf16.msra.mxu1 %v303_v45 }
  0x1c   :  { %306 = vmatprep.subr.bf16.mxu1 %v305_v46 }
  0x1f   :  { %308 = vmatpush3.bf16.msra.mxu1 %v307_v49 }
  0x20   :  { %310 = vmatprep.subr.bf16.mxu1 %v309_v52 }
  0x23   :  { %312 = vmatpush3.bf16.msra.mxu1 %v311_v55 }
  0xdb   :  { %v107_v63 = vpop.f32.mrb[0].mxu0 }
  0xdc   :  { %v108_v0 = vadd.f32 %v107_v63, %v30_v61  ;;  %v109_v1 = vpop.f32.mrb[1].mxu0 }
  0xdd   :  { %v110_v2 = vadd.f32 %v109_v1, %v34_v62 }
  0xde   :  { %v112_v4 = vmax.f32 %v108_v0, 0.0 }
  0xdf   :  { %v113_v3 = vmax.f32 %v110_v2, 0.0 }
  0xe1   :  { %217 = vmatprep.mubr.f32.mxu1 %v113_v3 }
  0xe2   :  { %218 = vmatmul.mubr.f32.vlgmr.msra.gmra.mrb[0].mxu1 %v112_v4 }
 0x1b5   :  { %v274_v5 = vpop.f32.mrb[0].mxu1 }
 0x1b6   :  { %v275_v6 = vpop.f32.mrb[1].mxu1 }
 0x1b7   :  { %v276_v8 = vadd.f32 %v275_v6, %v274_v5 }
 0x1b9   :  { %v220_v9 = vadd.f32 %v276_v8, %v241_v7 }
 0x1bb   :  { %v224_v10 = vsel %vm223_vm1, %v220_v9, -inf }
 0x1bc   :  { %225 = vmax.xlane.f32.xlu0 %v224_v10 }
 0x249   :  { %v226_v11 = vpop.xlane.xlu0 %225 }
 0x24a   :  { %v227_v12 = vsub.f32 %v220_v9, %v226_v11 }
 0x24c   :  { %v228_v13 = vmul.f32 1.442695, %v227_v12 }
 0x24e   :  { %314 = vpow2.f32 %v228_v13 }
 0x258   :  { %v315_v14 = vpop.eup %314 }
 0x259   :  { %v230_v15 = vsel %vm223_vm1, %v315_v14, 0.0 }
 0x25a   :  { %231 = vadd.xlane.f32.xlu0 %v230_v15 }
 0x2e7   :  { %v232_v16 = vpop.xlane.xlu0 %231 }
 0x2e8   :  { %316 = vrcp.f32 %v232_v16 }
 0x2f2   :  { %v317_v17 = vpop.eup %316 }
 0x2f3   :  { %v234_v18 = vmul.f32 %v317_v17, %v315_v14 }
 0x2f5   :  { %235 = vst.msk [vmem:[%s477_s5] sm:$0xff] %vm223_vm1, %v234_v18 }

</bundles_post_ra>
